<compile_context>
chip_gen: v5e
topology: v5e:2x2
jax: 0.10.0
libtpu: 0.0.40
codegen_flags: <defaults>
</compile_context>

<pallas_src>
import jax
import jax.numpy as jnp
from jax.experimental import pallas as pl
from jax.experimental.pallas import tpu as pltpu

PARM_FACTOR = 1
H1 = 128 * PARM_FACTOR
H2 = 64 * PARM_FACTOR
H3 = 32 * PARM_FACTOR
H4 = 1


def _mlp_kernel(x_ref, w1t_ref, b1_ref, w2t_ref, b2_ref, w3t_ref, b3_ref,
                w4t_ref, b4_ref, o_ref):
    # One small bf16 transpose of the x tile: (tb, D) -> (D, tb). Batch goes to
    # lanes for the whole kernel.
    x_t = x_ref[...].astype(jnp.bfloat16).T                      # (D, tb) bf16

    # Layer 1: (H1, D) @ (D, tb) -> (H1, tb); bf16 MXU, f32 accumulate.
    h = jnp.dot(w1t_ref[...], x_t, preferred_element_type=jnp.float32)
    # Fused bias + ReLU (f32 VPU) + bf16 downcast: only bf16 activations stay live.
    h = jnp.maximum(h + b1_ref[...], 0.0).astype(jnp.bfloat16)   # (H1, tb)

    # Layer 2: (H2, H1) @ (H1, tb) -> (H2, tb)
    h = jnp.dot(w2t_ref[...], h, preferred_element_type=jnp.float32)
    h = jnp.maximum(h + b2_ref[...], 0.0).astype(jnp.bfloat16)   # (H2, tb)

    # Layer 3: (H3, H2) @ (H2, tb) -> (H3, tb)
    h = jnp.dot(w3t_ref[...], h, preferred_element_type=jnp.float32)
    h = jnp.maximum(h + b3_ref[...], 0.0).astype(jnp.bfloat16)   # (H3, tb)

    # Layer 4: (1, H3) @ (H3, tb) -> lane-dense (1, tb); bf16 operands, tiny op,
    # no epilogue transpose needed.
    out = jnp.dot(w4t_ref[...], h, preferred_element_type=jnp.float32) + b4_ref[...]
    o_ref[...] = out.astype(o_ref.dtype)


def _pick_tb(B, tb, max_tb=4096):
    """Pick a batch tile: multiple of 128 (lane-dense everywhere), divides B,
    as large as possible up to max_tb (v7x-safe VMEM), grid >= 2 whenever
    possible (double-buffered x DMA; both v7x TensorCores busy)."""
    if tb is not None:
        assert B % tb == 0, "tb must divide B"
        assert tb == B or tb % 128 == 0, "tb must be a multiple of 128 (or == B)"
        return tb
    if B % 128 != 0 or B < 256:
        return B                       # small/ragged batch: single full-array tile
    cap = min(max_tb, B // 2)
    d = (cap // 128) * 128
    while d >= 128:
        if B % d == 0:
            return d
        d -= 128
    return B                           # fallback: untiled


def time_prediction_forward(x, params, *, tb=None, max_tb=4096):
    """x: (B, input_dim) float32. params: dict of f32 weights/biases.

    Returns (B, 1) to match the PyTorch module. Note: the kernel itself emits a
    lane-dense (1, B) row; the trailing reshape costs one extra small HBM
    relayout outside the kernel — consumers that can accept (1, B) should take
    the pre-reshape result instead.
    """
    B, D = x.shape
    tb = _pick_tb(B, tb, max_tb)
    n_tiles = B // tb

    # Pre-transposed weights (bf16, MXU-native); biases as f32 columns so they
    # broadcast along the lane (batch) axis inside the kernel.
    w1t = params["w1"].T.astype(jnp.bfloat16)          # (H1, D)
    w2t = params["w2"].T.astype(jnp.bfloat16)          # (H2, H1)
    w3t = params["w3"].T.astype(jnp.bfloat16)          # (H3, H2)
    w4t = params["w4"].T.astype(jnp.bfloat16)          # (1, H3)
    b1 = params["b1"].reshape(H1, 1).astype(jnp.float32)
    b2 = params["b2"].reshape(H2, 1).astype(jnp.float32)
    b3 = params["b3"].reshape(H3, 1).astype(jnp.float32)
    b4 = params["b4"].reshape(H4, 1).astype(jnp.float32)

    def full(shape):
        # Constant block index across the batch grid -> fetched once, resident.
        return pl.BlockSpec(shape, lambda i: (0,) * len(shape))

    flops = 2 * B * (D * H1 + H1 * H2 + H2 * H3 + H3 * H4)
    weight_bytes = 2 * (w1t.size + w2t.size + w3t.size + w4t.size) \
        + 4 * (b1.size + b2.size + b3.size + b4.size)
    bytes_accessed = B * D * 4 + B * 4 + weight_bytes

    out = pl.pallas_call(
        _mlp_kernel,
        out_shape=jax.ShapeDtypeStruct((1, B), jnp.float32),
        grid_spec=pltpu.PrefetchScalarGridSpec(
            num_scalar_prefetch=0,
            grid=(n_tiles,),
            in_specs=[
                pl.BlockSpec((tb, D), lambda i: (i, 0)),       # x, tiled over batch
                full(w1t.shape), full(b1.shape),
                full(w2t.shape), full(b2.shape),
                full(w3t.shape), full(b3.shape),
                full(w4t.shape), full(b4.shape),
            ],
            # Lane-dense output: one (1, tb) row per tile of the (1, B) result.
            out_specs=pl.BlockSpec((1, tb), lambda i: (0, i)),
        ),
        compiler_params=pltpu.CompilerParams(
            dimension_semantics=("parallel",),
            vmem_limit_bytes=48 * 1024 * 1024,
        ),
        cost_estimate=pl.CostEstimate(
            flops=flops, transcendentals=0, bytes_accessed=bytes_accessed),
    )(x, w1t, b1, w2t, b2, w3t, b3, w4t, b4)
    return out.reshape(B, 1)


def init_params(key, input_dim):
    """Deterministic synthetic init (Kaiming-uniform-ish like nn.Linear)."""
    def linear(k, fan_in, fan_out):
        kw, kb = jax.random.split(k)
        bound = 1.0 / jnp.sqrt(jnp.float32(fan_in))
        w = jax.random.uniform(kw, (fan_in, fan_out), jnp.float32, -bound, bound)
        b = jax.random.uniform(kb, (1, fan_out), jnp.float32, -bound, bound)
        return w, b

    k1, k2, k3, k4 = jax.random.split(key, 4)
    w1, b1 = linear(k1, input_dim, H1)
    w2, b2 = linear(k2, H1, H2)
    w3, b3 = linear(k3, H2, H3)
    w4, b4 = linear(k4, H3, H4)
    return {"w1": w1, "b1": b1, "w2": w2, "b2": b2,
            "w3": w3, "b3": b3, "w4": w4, "b4": b4}


def reference_forward(x, p):
    h = jnp.maximum(x @ p["w1"] + p["b1"], 0.0)
    h = jnp.maximum(h @ p["w2"] + p["b2"], 0.0)
    h = jnp.maximum(h @ p["w3"] + p["b3"], 0.0)
    return h @ p["w4"] + p["b4"]


if __name__ == "__main__":
    key = jax.random.PRNGKey(0)
    kx, kp = jax.random.split(key)

    # Small shapes consistent with the module (input_dim free; batch arbitrary).
    batch = 8
    input_dim = 16
    x = jax.random.normal(kx, (batch, input_dim), jnp.float32)
    params = init_params(kp, input_dim)

    out = jax.block_until_ready(time_prediction_forward(x, params))
    ref = reference_forward(x, params)
    assert out.shape == (batch, 1)
    # bf16 matmuls -> relaxed tolerance vs the pure-f32 reference.
    assert jnp.allclose(out, ref, atol=2e-2, rtol=5e-2), "mismatch vs reference (small)"

    # Exercise the tiled / multi-grid path (tb=2048, grid=2, lane-dense output).
    batch_big = 4096
    xb = jax.random.normal(jax.random.PRNGKey(1), (batch_big, input_dim), jnp.float32)
    out_big = jax.block_until_ready(time_prediction_forward(xb, params))
    ref_big = reference_forward(xb, params)
    assert out_big.shape == (batch_big, 1)
    assert jnp.allclose(out_big, ref_big, atol=2e-2, rtol=5e-2), "mismatch vs reference (tiled)"

    print("KERNEL_OK")
</pallas_src>

<mosaic_0001>
module attributes {stable_mosaic.version = 11 : i64} {
  func.func @_mlp_kernel(%arg0: i32, %arg1: memref<8x16xf32, #tpu.memory_space<vmem>>, %arg2: memref<128x16xbf16, #tpu.memory_space<vmem>>, %arg3: memref<128x1xf32, #tpu.memory_space<vmem>>, %arg4: memref<64x128xbf16, #tpu.memory_space<vmem>>, %arg5: memref<64x1xf32, #tpu.memory_space<vmem>>, %arg6: memref<32x64xbf16, #tpu.memory_space<vmem>>, %arg7: memref<32x1xf32, #tpu.memory_space<vmem>>, %arg8: memref<1x32xbf16, #tpu.memory_space<vmem>>, %arg9: memref<1x1xf32, #tpu.memory_space<vmem>>, %arg10: memref<1x8xf32, #tpu.memory_space<vmem>>) attributes {dimension_semantics = [#tpu.dimension_semantics<parallel>], iteration_bounds = array<i64: 1>, scalar_prefetch = 0 : i64, scratch_operands = 0 : i64, tpu.core_type = #tpu.core_type<tc>, window_params = [{transform_indices = @transform_0, window_bounds = array<i64: 8, 16>}, {pipeline_mode = #tpu.pipeline_mode<synchronous>, transform_indices = @transform_1, window_bounds = array<i64: 128, 16>}, {pipeline_mode = #tpu.pipeline_mode<synchronous>, transform_indices = @transform_2, window_bounds = array<i64: 128, 1>}, {pipeline_mode = #tpu.pipeline_mode<synchronous>, transform_indices = @transform_3, window_bounds = array<i64: 64, 128>}, {pipeline_mode = #tpu.pipeline_mode<synchronous>, transform_indices = @transform_4, window_bounds = array<i64: 64, 1>}, {pipeline_mode = #tpu.pipeline_mode<synchronous>, transform_indices = @transform_5, window_bounds = array<i64: 32, 64>}, {pipeline_mode = #tpu.pipeline_mode<synchronous>, transform_indices = @transform_6, window_bounds = array<i64: 32, 1>}, {pipeline_mode = #tpu.pipeline_mode<synchronous>, transform_indices = @transform_7, window_bounds = array<i64: 1, 32>}, {pipeline_mode = #tpu.pipeline_mode<synchronous>, transform_indices = @transform_8, window_bounds = array<i64: 1, 1>}, {transform_indices = @transform_9, window_bounds = array<i64: 1, 8>}]} {
    %c0 = arith.constant 0 : index
    %c0_0 = arith.constant 0 : index
    %0 = vector.load %arg1[%c0, %c0_0] : memref<8x16xf32, #tpu.memory_space<vmem>>, vector<8x16xf32>
    %1 = arith.truncf %0 : vector<8x16xf32> to vector<8x16xbf16>
    %2 = tpu.transpose %1, [1, 0] : vector<8x16xbf16> -> vector<16x8xbf16>
    %c0_1 = arith.constant 0 : index
    %c0_2 = arith.constant 0 : index
    %3 = vector.load %arg2[%c0_1, %c0_2] : memref<128x16xbf16, #tpu.memory_space<vmem>>, vector<128x16xbf16>
    %cst = arith.constant dense<0.000000e+00> : vector<128x8xf32>
    %4 = tpu.matmul %3, %2, %cst {dimension_numbers = #tpu.dot_dimension_numbers<[1], [0], [0], [1], [0, 0, 1, 1], [], []>} : vector<128x16xbf16>, vector<16x8xbf16>, vector<128x8xf32> -> vector<128x8xf32>
    %c0_3 = arith.constant 0 : index
    %c0_4 = arith.constant 0 : index
    %5 = vector.load %arg3[%c0_3, %c0_4] : memref<128x1xf32, #tpu.memory_space<vmem>>, vector<128x1xf32>
    %6 = vector.broadcast %5 : vector<128x1xf32> to vector<128x8xf32>
    %7 = arith.addf %4, %6 : vector<128x8xf32>
    %cst_5 = arith.constant 0.000000e+00 : f32
    %8 = vector.broadcast %cst_5 : f32 to vector<128x8xf32>
    %9 = arith.maximumf %7, %8 : vector<128x8xf32>
    %10 = arith.truncf %9 : vector<128x8xf32> to vector<128x8xbf16>
    %c0_6 = arith.constant 0 : index
    %c0_7 = arith.constant 0 : index
    %11 = vector.load %arg4[%c0_6, %c0_7] : memref<64x128xbf16, #tpu.memory_space<vmem>>, vector<64x128xbf16>
    %cst_8 = arith.constant dense<0.000000e+00> : vector<64x8xf32>
    %12 = tpu.matmul %11, %10, %cst_8 {dimension_numbers = #tpu.dot_dimension_numbers<[1], [0], [0], [1], [0, 0, 1, 1], [], []>} : vector<64x128xbf16>, vector<128x8xbf16>, vector<64x8xf32> -> vector<64x8xf32>
    %c0_9 = arith.constant 0 : index
    %c0_10 = arith.constant 0 : index
    %13 = vector.load %arg5[%c0_9, %c0_10] : memref<64x1xf32, #tpu.memory_space<vmem>>, vector<64x1xf32>
    %14 = vector.broadcast %13 : vector<64x1xf32> to vector<64x8xf32>
    %15 = arith.addf %12, %14 : vector<64x8xf32>
    %cst_11 = arith.constant 0.000000e+00 : f32
    %16 = vector.broadcast %cst_11 : f32 to vector<64x8xf32>
    %17 = arith.maximumf %15, %16 : vector<64x8xf32>
    %18 = arith.truncf %17 : vector<64x8xf32> to vector<64x8xbf16>
    %c0_12 = arith.constant 0 : index
    %c0_13 = arith.constant 0 : index
    %19 = vector.load %arg6[%c0_12, %c0_13] : memref<32x64xbf16, #tpu.memory_space<vmem>>, vector<32x64xbf16>
    %cst_14 = arith.constant dense<0.000000e+00> : vector<32x8xf32>
    %20 = tpu.matmul %19, %18, %cst_14 {dimension_numbers = #tpu.dot_dimension_numbers<[1], [0], [0], [1], [0, 0, 1, 1], [], []>} : vector<32x64xbf16>, vector<64x8xbf16>, vector<32x8xf32> -> vector<32x8xf32>
    %c0_15 = arith.constant 0 : index
    %c0_16 = arith.constant 0 : index
    %21 = vector.load %arg7[%c0_15, %c0_16] : memref<32x1xf32, #tpu.memory_space<vmem>>, vector<32x1xf32>
    %22 = vector.broadcast %21 : vector<32x1xf32> to vector<32x8xf32>
    %23 = arith.addf %20, %22 : vector<32x8xf32>
    %cst_17 = arith.constant 0.000000e+00 : f32
    %24 = vector.broadcast %cst_17 : f32 to vector<32x8xf32>
    %25 = arith.maximumf %23, %24 : vector<32x8xf32>
    %26 = arith.truncf %25 : vector<32x8xf32> to vector<32x8xbf16>
    %c0_18 = arith.constant 0 : index
    %c0_19 = arith.constant 0 : index
    %27 = vector.load %arg8[%c0_18, %c0_19] : memref<1x32xbf16, #tpu.memory_space<vmem>>, vector<1x32xbf16>
    %cst_20 = arith.constant dense<0.000000e+00> : vector<1x8xf32>
    %28 = tpu.matmul %27, %26, %cst_20 {dimension_numbers = #tpu.dot_dimension_numbers<[1], [0], [0], [1], [0, 0, 1, 1], [], []>} : vector<1x32xbf16>, vector<32x8xbf16>, vector<1x8xf32> -> vector<1x8xf32>
    %c0_21 = arith.constant 0 : index
    %c0_22 = arith.constant 0 : index
    %29 = vector.load %arg9[%c0_21, %c0_22] : memref<1x1xf32, #tpu.memory_space<vmem>>, vector<1x1xf32>
    %30 = vector.broadcast %29 : vector<1x1xf32> to vector<1x8xf32>
    %31 = arith.addf %28, %30 : vector<1x8xf32>
    %c0_23 = arith.constant 0 : index
    %c0_24 = arith.constant 0 : index
    %32 = vector.load %arg10[%c0_23, %c0_24] : memref<1x8xf32, #tpu.memory_space<vmem>>, vector<1x8xf32>
    tpu.vector_store %arg10[%c0_23, %c0_24], %31 {strides = array<i32>} : memref<1x8xf32, #tpu.memory_space<vmem>>, vector<1x8xf32>,
    return
  }
  func.func @transform_0(%arg0: i32) -> (i32, i32) {
    %c0_i32 = arith.constant 0 : i32
    %c0_i32_0 = arith.constant 0 : i32
    return %arg0, %c0_i32 : i32, i32
  }
  func.func @transform_1(%arg0: i32) -> (i32, i32) {
    %c0_i32 = arith.constant 0 : i32
    %c0_i32_0 = arith.constant 0 : i32
    %c0_i32_1 = arith.constant 0 : i32
    return %c0_i32, %c0_i32_0 : i32, i32
  }
  func.func @transform_2(%arg0: i32) -> (i32, i32) {
    %c0_i32 = arith.constant 0 : i32
    %c0_i32_0 = arith.constant 0 : i32
    %c0_i32_1 = arith.constant 0 : i32
    return %c0_i32, %c0_i32_0 : i32, i32
  }
  func.func @transform_3(%arg0: i32) -> (i32, i32) {
    %c0_i32 = arith.constant 0 : i32
    %c0_i32_0 = arith.constant 0 : i32
    %c0_i32_1 = arith.constant 0 : i32
    return %c0_i32, %c0_i32_0 : i32, i32
  }
  func.func @transform_4(%arg0: i32) -> (i32, i32) {
    %c0_i32 = arith.constant 0 : i32
    %c0_i32_0 = arith.constant 0 : i32
    %c0_i32_1 = arith.constant 0 : i32
    return %c0_i32, %c0_i32_0 : i32, i32
  }
  func.func @transform_5(%arg0: i32) -> (i32, i32) {
    %c0_i32 = arith.constant 0 : i32
    %c0_i32_0 = arith.constant 0 : i32
    %c0_i32_1 = arith.constant 0 : i32
    return %c0_i32, %c0_i32_0 : i32, i32
  }
  func.func @transform_6(%arg0: i32) -> (i32, i32) {
    %c0_i32 = arith.constant 0 : i32
    %c0_i32_0 = arith.constant 0 : i32
    %c0_i32_1 = arith.constant 0 : i32
    return %c0_i32, %c0_i32_0 : i32, i32
  }
  func.func @transform_7(%arg0: i32) -> (i32, i32) {
    %c0_i32 = arith.constant 0 : i32
    %c0_i32_0 = arith.constant 0 : i32
    %c0_i32_1 = arith.constant 0 : i32
    return %c0_i32, %c0_i32_0 : i32, i32
  }
  func.func @transform_8(%arg0: i32) -> (i32, i32) {
    %c0_i32 = arith.constant 0 : i32
    %c0_i32_0 = arith.constant 0 : i32
    %c0_i32_1 = arith.constant 0 : i32
    return %c0_i32, %c0_i32_0 : i32, i32
  }
  func.func @transform_9(%arg0: i32) -> (i32, i32) {
    %c0_i32 = arith.constant 0 : i32
    %c0_i32_0 = arith.constant 0 : i32
    return %c0_i32, %arg0 : i32, i32
  }
}

</mosaic_0001>

<bundles_post_ra>
// kernel: tpu_custom_call.1
= control target key start
LH: loop header
LB: loop body
LE: loop exit
PB: predicated region body
PF: predicated region fallthrough
CT: control target
= control target key end

     0   :  { %s852_s0 = inlined_call_operand.vmem [shape: f32[8,16], index: 0, kind: input, shape index: {}]   ;;  %s853_s1 = inlined_call_operand.vmem [shape: bf16[128,16], index: 1, kind: input, shape index: {}]   ;;  %s854_s2 = inlined_call_operand.vmem [shape: f32[128,1], index: 2, kind: input, shape index: {}]   ;;  %s855_s3 = inlined_call_operand.vmem [shape: bf16[64,128], index: 3, kind: input, shape index: {}]   ;;  %s856_s4 = inlined_call_operand.vmem [shape: f32[64,1], index: 4, kind: input, shape index: {}]   ;;  %s857_s5 = inlined_call_operand.vmem [shape: bf16[32,64], index: 5, kind: input, shape index: {}]   ;;  %s858_s6 = inlined_call_operand.vmem [shape: f32[32,1], index: 6, kind: input, shape index: {}]   ;;  %s859_s7 = inlined_call_operand.vmem [shape: bf16[1,32], index: 7, kind: input, shape index: {}]   ;;  %s860_s8 = inlined_call_operand.<no memory space> [shape: f32[1,1], index: 8, kind: input, shape index: {}]   ;;  %s861_s9 = inlined_call_operand.hbm [shape: f32[1,8], index: 9, kind: output, shape index: {}]  }
   0x1   :  { %v14_v0 = vstv %s860_s8 }
   0x2   :  { %15 = vst [vmem:[#allocation2] sm:$0x1] %v14_v0 }
   0x3   :  { %v68_v1 = vld [vmem:[%s854_s2 + $0x70] sm:$0xff]  ;;  %v66_v2 = vld [vmem:[%s854_s2 + $0x60] sm:$0xff]  ;;  %vm190_vm0 = vcmask 130048   ;;  %v646_v4 = vmov 0   ;;  %v69_v8 = vld [vmem:[%s854_s2 + $0x78] sm:$0xff] }
   0x4   :  { %v36_v3 = vld [vmem:[%s852_s0] sm:$0xff]  ;;  %618 = vset.pattern.permute.xlu1 %v646_v4  ;;  %617 = vset.pattern.permute.xlu0 %v646_v4  ;;  %v64_v6 = vld [vmem:[%s854_s2 + $0x50] sm:$0xff] }
   0x5   :  { %v37_v5 = vpack.c.bf16 %v36_v3, %v36_v3  ;;  %142 = vperm.xlu0 %617, %v68_v1   ;;  %132 = vperm.xlu1 %618, %v66_v2  }
   0x6   :  { %619 = vset.pattern.permute.xlu2 %v646_v4 }
   0x7   :  { %v216_v7 = vsel %vm190_vm0, %v37_v5, 0  ;;  %122 = vperm.xlu2 %619, %v64_v6  }
   0x8   :  { %225 = vmatpush.bf16.xpose.msra.mxu0 %v216_v7  ;;  %606 = vmatpush.bf16.xpose.msra.mxu3 %v216_v7 }
   0x9   :  { %16 = vsyncpa [#allocation4], 0  ;;  %v67_v9 = vld [vmem:[%s854_s2 + $0x68] sm:$0xff]  ;;  %v592_v10 = vld [vmem:[%s853_s1] sm:$0xff]  ;;  %vm450_vm1 = vcmask 523264   ;;  %vm490_vm2 = vcmask 261120  }
   0xa   :  { %v597_v11 = vld [vmem:[%s853_s1 + $0x28] sm:$0xff]  ;;  %v65_v12 = vld [vmem:[%s854_s2 + $0x58] sm:$0xff]  ;;  %v62_v14 = vld [vmem:[%s854_s2 + $0x40] sm:$0xff]  ;;  %s647_s21 = smov [#allocation3]   ;;  %s516_s25 = sshll.u32 %s861_s9, 4  ;;  %vm507_vm3 = vcmask 57344   ;;  %s517_s25 = int_to_ptr.hbm [resolvable:$true] %s516_s25 }
   0xb   :  { %v63_v13 = vld [vmem:[%s854_s2 + $0x48] sm:$0xff]  ;;  %v60_v15 = vld [vmem:[%s854_s2 + $0x30] sm:$0xff]  ;;  %v61_v16 = vld [vmem:[%s854_s2 + $0x38] sm:$0xff]  ;;  %s514_s22 = sshll.u32 %s647_s21, 4  ;;  %s515_s22 = int_to_ptr.vmem [resolvable:$true] %s514_s22 }
   0xc   :  { %v58_v17 = vld [vmem:[%s854_s2 + $0x20] sm:$0xff]  ;;  %v593_v18 = vld [vmem:[%s853_s1 + $0x8] sm:$0xff]  ;;  %v598_v19 = vld [vmem:[%s853_s1 + $0x30] sm:$0xff] }
   0xd   :  { %147 = vperm.xlu0 %617, %v69_v8   ;;  %137 = vperm.xlu1 %618, %v67_v9   ;;  %v59_v20 = vld [vmem:[%s854_s2 + $0x28] sm:$0xff]  ;;  %v57_v21 = vld [vmem:[%s854_s2 + $0x18] sm:$0xff]  ;;  %v56_v22 = vld [vmem:[%s854_s2 + $0x10] sm:$0xff] }
   0xe   :  { %v54_v23 = vld [vmem:[%s854_s2] sm:$0xff]  ;;  %v305_v24 = vld [vmem:[%s856_s4 + $0x30] sm:$0xff]  ;;  %v55_v25 = vld [vmem:[%s854_s2 + $0x8] sm:$0xff] }
   0xf   :  { %557 = vmatmul.msk.bf16.vlgmr.msra.gmra.mxu0 %vm190_vm0, %v592_v10  ;;  %562 = vmatmul.msk.bf16.vlgmr.msra.gmra.mxu3 %vm190_vm0, %v597_v11  ;;  %v594_v26 = vld [vmem:[%s853_s1 + $0x10] sm:$0xff]  ;;  %v599_v27 = vld [vmem:[%s853_s1 + $0x38] sm:$0xff]  ;;  %v304_v29 = vld [vmem:[%s856_s4 + $0x28] sm:$0xff] }
  0x10   :  { %127 = vperm.xlu2 %619, %v65_v12   ;;  %v306_v28 = vld [vmem:[%s856_s4 + $0x38] sm:$0xff]  ;;  %v303_v30 = vld [vmem:[%s856_s4 + $0x20] sm:$0xff]  ;;  %v301_v31 = vld [vmem:[%s856_s4 + $0x10] sm:$0xff] }
  0x11   :  { %v299_v32 = vld [vmem:[%s856_s4] sm:$0xff]  ;;  %v302_v33 = vld [vmem:[%s856_s4 + $0x18] sm:$0xff]  ;;  %v300_v35 = vld [vmem:[%s856_s4 + $0x8] sm:$0xff] }
  0x12   :  { %v595_v34 = vld [vmem:[%s853_s1 + $0x18] sm:$0xff]  ;;  %v418_v37 = vld [vmem:[%s858_s6 + $0x10] sm:$0xff]  ;;  %v416_v38 = vld [vmem:[%s858_s6] sm:$0xff] }
  0x13   :  { %v419_v36 = vld [vmem:[%s858_s6 + $0x18] sm:$0xff]  ;;  %v483_v39 = vld [vmem:[#allocation2] sm:$0x1]  ;;  %v417_v40 = vld [vmem:[%s858_s6 + $0x8] sm:$0xff] }
  0x14   :  { %v596_v41 = vld [vmem:[%s853_s1 + $0x20] sm:$0xff] }
  0x15   :  { %117 = vperm.xlu1 %618, %v63_v13   ;;  %112 = vperm.xlu0 %617, %v62_v14  }
  0x18   :  { %102 = vperm.xlu2 %619, %v60_v15  }
  0x1d   :  { %107 = vperm.xlu0 %617, %v61_v16   ;;  %92 = vperm.xlu1 %618, %v58_v17  }
  0x1f   :  { %558 = vmatmul.msk.bf16.gmra.mxu0 %vm190_vm0, %v593_v18  ;;  %563 = vmatmul.msk.bf16.gmra.mxu3 %vm190_vm0, %v598_v19 }
  0x20   :  { %97 = vperm.xlu2 %619, %v59_v20  }
  0x25   :  { %87 = vperm.xlu1 %618, %v57_v21   ;;  %82 = vperm.xlu0 %617, %v56_v22  }
  0x28   :  { %72 = vperm.xlu2 %619, %v54_v23  }
  0x2d   :  { %339 = vperm.xlu1 %618, %v305_v24   ;;  %77 = vperm.xlu0 %617, %v55_v25  }
  0x2f   :  { %559 = vmatmul.msk.bf16.gmra.mxu0 %vm190_vm0, %v594_v26  ;;  %564 = vmatmul.msk.bf16.gmra.mxu3 %vm190_vm0, %v599_v27 }
  0x30   :  { %344 = vperm.xlu2 %619, %v306_v28  }
  0x35   :  { %334 = vperm.xlu1 %618, %v304_v29   ;;  %329 = vperm.xlu0 %617, %v303_v30  }
  0x38   :  { %319 = vperm.xlu2 %619, %v301_v31  }
  0x3d   :  { %309 = vperm.xlu1 %618, %v299_v32   ;;  %324 = vperm.xlu0 %617, %v302_v33  }
  0x3f   :  { %560 = vmatmul.msk.bf16.gmra.mxu0 %vm190_vm0, %v595_v34 }
  0x40   :  { %314 = vperm.xlu2 %619, %v300_v35  }
  0x45   :  { %437 = vperm.xlu1 %618, %v419_v36   ;;  %432 = vperm.xlu0 %617, %v418_v37  }
  0x48   :  { %422 = vperm.xlu2 %619, %v416_v38  }
  0x4d   :  { %486 = vperm.xlu1 %618, %v483_v39   ;;  %427 = vperm.xlu0 %617, %v417_v40  }
  0x4f   :  { %561 = vmatmul.msk.bf16.gmra.mxu0 %vm190_vm0, %v596_v41 }
  0x61   :  { %v123_v42 = vpop.permute.xlu2 %122 }
  0x6a   :  { %v128_v44 = vpop.permute.xlu2 %127 }
  0x72   :  { %v103_v46 = vpop.permute.xlu2 %102 }
  0x77   :  { %v143_v43 = vpop.permute.xlu0 %142  ;;  %v133_v3 = vpop.permute.xlu1 %132 }
  0x7a   :  { %v98_v50 = vpop.permute.xlu2 %97 }
  0x7f   :  { %v148_v45 = vpop.permute.xlu0 %147  ;;  %v138_v7 = vpop.permute.xlu1 %137 }
  0x82   :  { %v73_v55 = vpop.permute.xlu2 %72 }
  0x87   :  { %v113_v47 = vpop.permute.xlu0 %112  ;;  %v118_v25 = vpop.permute.xlu1 %117 }
  0x8c   :  { %v227_v48 = vpop.f32.mrf.mxu0 }
  0x8d   :  { %v228_v57 = vadd.f32 %v227_v48, %v73_v55 }
  0x8f   :  { %v108_v49 = vpop.permute.xlu0 %107  ;;  %v267_v61 = vmax.f32 %v228_v57, 0.0  ;;  %v93_v27 = vpop.permute.xlu1 %92 }
  0x92   :  { %v252_v51 = vpop.f32.mrf.mxu3 }
  0x93   :  { %v253_v15 = vadd.f32 %v252_v51, %v123_v42  ;;  %v603_v51 = vld [vmem:[%s855_s3 + $0x18] sm:$0xff] }
  0x94   :  { %v229_v52 = vpop.f32.mrf.mxu0 }
  0x95   :  { %v277_v20 = vmax.f32 %v253_v15, 0.0 }
  0x97   :  { %v821_v53 = vpop.permute.xlu0 %82  ;;  %v88_v40 = vpop.permute.xlu1 %87 }
  0x9a   :  { %v254_v54 = vpop.f32.mrf.mxu3 }
  0x9b   :  { %v255_v16 = vadd.f32 %v254_v54, %v128_v44 }
  0x9c   :  { %v232_v56 = vpop.f32.mrf.mxu0 }
  0x9d   :  { %v278_v21 = vmax.f32 %v255_v16, 0.0  ;;  %v233_v44 = vadd.f32 %v232_v56, %v821_v53  ;;  %v602_v53 = vld [vmem:[%s855_s3 + $0x10] sm:$0xff] }
  0x9f   :  { %v78_v58 = vpop.permute.xlu0 %77  ;;  %v288_v24 = vpack.c.bf16 %v278_v21, %v277_v20  ;;  %v269_v48 = vmax.f32 %v233_v44, 0.0  ;;  %v340_v57 = vpop.permute.xlu1 %339 }
  0xa0   :  { %v230_v59 = vadd.f32 %v229_v52, %v78_v58  ;;  %v601_v52 = vld [vmem:[%s855_s3 + $0x8] sm:$0xff] }
  0xa2   :  { %v257_v60 = vpop.f32.mrf.mxu3  ;;  %v268_v62 = vmax.f32 %v230_v59, 0.0  ;;  %v345_v59 = vpop.permute.xlu2 %344 }
  0xa3   :  { %v258_v9 = vadd.f32 %v257_v60, %v133_v3 }
  0xa4   :  { %v234_v63 = vpop.f32.mrf.mxu0  ;;  %v823_v0 = vpack.c.bf16 %v268_v62, %v267_v61 }
  0xa5   :  { %v279_v17 = vmax.f32 %v258_v9, 0.0  ;;  %v235_v41 = vadd.f32 %v234_v63, %v88_v40 }
  0xa7   :  { %v330_v3 = vpop.permute.xlu0 %329 }
  0xaa   :  { %v259_v1 = vpop.f32.mrf.mxu3 }
  0xab   :  { %v260_v10 = vadd.f32 %v259_v1, %v138_v7 }
  0xac   :  { %v237_v2 = vpop.f32.mrf.mxu0 }
  0xad   :  { %v280_v18 = vmax.f32 %v260_v10, 0.0  ;;  %v238_v38 = vadd.f32 %v237_v2, %v93_v27  ;;  %v605_v27 = vld [vmem:[%s857_s5 + $0x8] sm:$0xff] }
  0xaf   :  { %v289_v22 = vpack.c.bf16 %v280_v18, %v279_v17 }
  0xb2   :  { %v262_v4 = vpop.f32.mrf.mxu3 }
  0xb3   :  { %v263_v6 = vadd.f32 %v262_v4, %v143_v43 }
  0xb4   :  { %v239_v5 = vpop.f32.mrf.mxu0 }
  0xb5   :  { %v281_v11 = vmax.f32 %v263_v6, 0.0  ;;  %v240_v35 = vadd.f32 %v239_v5, %v98_v50  ;;  %v600_v50 = vld [vmem:[%s855_s3] sm:$0xff]  ;;  %v320_v5 = vpop.permute.xlu2 %319  ;;  %v335_v6 = vpop.permute.xlu1 %334 }
  0xb7   :  { %v272_v42 = vmax.f32 %v240_v35, 0.0 }
  0xba   :  { %v264_v8 = vpop.f32.mrf.mxu3 }
  0xbb   :  { %v265_v12 = vadd.f32 %v264_v8, %v148_v45  ;;  %v271_v45 = vmax.f32 %v238_v38, 0.0  ;;  %v325_v8 = vpop.permute.xlu0 %324 }
  0xbc   :  { %v242_v13 = vpop.f32.mrf.mxu0 }
  0xbd   :  { %v282_v14 = vmax.f32 %v265_v12, 0.0  ;;  %v243_v32 = vadd.f32 %v242_v13, %v103_v46  ;;  %v285_v46 = vpack.c.bf16 %v272_v42, %v271_v45  ;;  %v315_v15 = vpop.permute.xlu2 %314 }
  0xbf   :  { %v290_v19 = vpack.c.bf16 %v282_v14, %v281_v11  ;;  %v273_v39 = vmax.f32 %v243_v32, 0.0 }
  0xc1   :  { %371 = vmatpush.bf16.msra.mxu1 %v290_v19  ;;  %607 = vmatpush.bf16.msra.mxu2 %v290_v19  ;;  %v310_v19 = vpop.permute.xlu1 %309 }
  0xc4   :  { %v244_v23 = vpop.f32.mrf.mxu0 }
  0xc5   :  { %372 = vmatpush.bf16.msra.mxu1 %v289_v22  ;;  %608 = vmatpush.bf16.msra.mxu2 %v289_v22  ;;  %v245_v30 = vadd.f32 %v244_v23, %v108_v49  ;;  %v423_v38 = vpop.permute.xlu2 %422 }
  0xc7   :  { %v274_v36 = vmax.f32 %v245_v30, 0.0  ;;  %v433_v30 = vpop.permute.xlu0 %432 }
  0xc9   :  { %373 = vmatpush.bf16.msra.mxu1 %v288_v24  ;;  %609 = vmatpush.bf16.msra.mxu2 %v288_v24  ;;  %v286_v43 = vpack.c.bf16 %v274_v36, %v273_v39  ;;  %v438_v32 = vpop.permute.xlu1 %437 }
  0xcc   :  { %v247_v26 = vpop.f32.mrf.mxu0 }
  0xcd   :  { %v248_v28 = vadd.f32 %v247_v26, %v113_v47  ;;  %v270_v47 = vmax.f32 %v235_v41, 0.0  ;;  %v604_v26 = vld [vmem:[%s857_s5] sm:$0xff] }
  0xcf   :  { %v275_v33 = vmax.f32 %v248_v28, 0.0  ;;  %v284_v49 = vpack.c.bf16 %v270_v47, %v269_v48  ;;  %v482_v47 = vld [vmem:[%s859_s7] sm:$0x1] }
  0xd4   :  { %v249_v29 = vpop.f32.mrf.mxu0 }
  0xd5   :  { %v250_v31 = vadd.f32 %v249_v29, %v118_v25 }
  0xd7   :  { %v276_v34 = vmax.f32 %v250_v31, 0.0 }
  0xd9   :  { %v287_v37 = vpack.c.bf16 %v276_v34, %v275_v33  ;;  %v428_v34 = vpop.permute.xlu0 %427 }
  0xdb   :  { %374 = vmatpush.bf16.msra.mxu1 %v287_v37  ;;  %610 = vmatpush.bf16.msra.mxu2 %v287_v37 }
  0xdf   :  { %375 = vmatpush.bf16.msra.mxu1 %v286_v43  ;;  %611 = vmatpush.bf16.msra.mxu2 %v286_v43 }
  0xe3   :  { %376 = vmatpush.bf16.msra.mxu1 %v285_v46  ;;  %612 = vmatpush.bf16.msra.mxu2 %v285_v46  ;;  %v487_v46 = vpop.permute.xlu1 %486 }
  0xe4   :  { %v489_v48 = vperm.slane %v487_v46, 0 }
  0xe7   :  { %377 = vmatpush.bf16.msra.mxu1 %v284_v49  ;;  %613 = vmatpush.bf16.msra.mxu2 %v284_v49 }
  0xeb   :  { %378 = vmatpush.bf16.msra.mxu1 %v823_v0  ;;  %614 = vmatpush.bf16.msra.mxu2 %v823_v0 }
  0xee   :  { %379 = vmatmul.bf16.vlgmr.msra.gmra.mxu1 %v600_v50  ;;  %394 = vmatmul.bf16.vlgmr.msra.gmra.mxu2 %v603_v51 }
  0xfe   :  { %384 = vmatmul.bf16.gmra.mxu1 %v601_v52 }
 0x10e   :  { %389 = vmatmul.bf16.gmra.mxu1 %v602_v53 }
 0x16b   :  { %v380_v54 = vpop.f32.mrf.mxu1 }
 0x16c   :  { %v381_v20 = vadd.f32 %v380_v54, %v310_v19 }
 0x16e   :  { %v400_v24 = vmax.f32 %v381_v20, 0.0 }
 0x171   :  { %v395_v55 = vpop.f32.mrf.mxu2 }
 0x172   :  { %v396_v58 = vadd.f32 %v395_v55, %v340_v57 }
 0x173   :  { %v382_v56 = vpop.f32.mrf.mxu1 }
 0x174   :  { %v406_v63 = vmax.f32 %v396_v58, 0.0  ;;  %v383_v16 = vadd.f32 %v382_v56, %v315_v15 }
 0x176   :  { %v401_v22 = vmax.f32 %v383_v16, 0.0 }
 0x178   :  { %v408_v25 = vpack.c.bf16 %v401_v22, %v400_v24 }
 0x179   :  { %v397_v60 = vpop.f32.mrf.mxu2 }
 0x17a   :  { %v398_v61 = vadd.f32 %v397_v60, %v345_v59 }
 0x17b   :  { %v385_v62 = vpop.f32.mrf.mxu1 }
 0x17c   :  { %v407_v0 = vmax.f32 %v398_v61, 0.0  ;;  %v386_v12 = vadd.f32 %v385_v62, %v320_v5 }
 0x17e   :  { %v411_v1 = vpack.c.bf16 %v407_v0, %v406_v63  ;;  %v402_v21 = vmax.f32 %v386_v12, 0.0 }
 0x180   :  { %461 = vmatpush.bf16.msrb.mxu2 %v411_v1 }
 0x183   :  { %v387_v2 = vpop.f32.mrf.mxu1 }
 0x184   :  { %v388_v10 = vadd.f32 %v387_v2, %v325_v8 }
 0x186   :  { %v403_v17 = vmax.f32 %v388_v10, 0.0 }
 0x188   :  { %v409_v23 = vpack.c.bf16 %v403_v17, %v402_v21 }
 0x18b   :  { %v390_v4 = vpop.f32.mrf.mxu1 }
 0x18c   :  { %v391_v7 = vadd.f32 %v390_v4, %v330_v3 }
 0x18e   :  { %v404_v13 = vmax.f32 %v391_v7, 0.0 }
 0x193   :  { %v392_v9 = vpop.f32.mrf.mxu1 }
 0x194   :  { %v393_v11 = vadd.f32 %v392_v9, %v335_v6 }
 0x196   :  { %v405_v14 = vmax.f32 %v393_v11, 0.0 }
 0x198   :  { %v410_v18 = vpack.c.bf16 %v405_v14, %v404_v13 }
 0x19a   :  { %462 = vmatpush.bf16.msrb.mxu2 %v410_v18 }
 0x19e   :  { %463 = vmatpush.bf16.msrb.mxu2 %v409_v23 }
 0x1a2   :  { %464 = vmatpush.bf16.msrb.mxu2 %v408_v25 }
 0x1a5   :  { %589 = vmatmul.msk.bf16.vlgmr.msrb.gmra.mxu2 %vm450_vm1, %v604_v26 }
 0x1b5   :  { %590 = vmatmul.msk.bf16.gmra.mxu2 %vm450_vm1, %v605_v27 }
 0x228   :  { %v466_v28 = vpop.f32.mrf.mxu2 }
 0x229   :  { %v467_v39 = vadd.f32 %v466_v28, %v423_v38 }
 0x22b   :  { %v476_v44 = vmax.f32 %v467_v39, 0.0 }
 0x230   :  { %v468_v29 = vpop.f32.mrf.mxu2 }
 0x231   :  { %v469_v36 = vadd.f32 %v468_v29, %v428_v34 }
 0x233   :  { %v477_v42 = vmax.f32 %v469_v36, 0.0 }
 0x235   :  { %v480_v45 = vpack.c.bf16 %v477_v42, %v476_v44 }
 0x238   :  { %v471_v31 = vpop.f32.mrf.mxu2 }
 0x239   :  { %v472_v33 = vadd.f32 %v471_v31, %v433_v30 }
 0x23b   :  { %v478_v40 = vmax.f32 %v472_v33, 0.0 }
 0x240   :  { %v473_v35 = vpop.f32.mrf.mxu2 }
 0x241   :  { %v474_v37 = vadd.f32 %v473_v35, %v438_v32 }
 0x243   :  { %v479_v41 = vmax.f32 %v474_v37, 0.0 }
 0x245   :  { %v481_v43 = vpack.c.bf16 %v479_v41, %v478_v40 }
 0x247   :  { %500 = vmatpush.bf16.msrb.mxu3 %v481_v43 }
 0x24b   :  { %501 = vmatpush.bf16.msrb.mxu3 %v480_v45 }
 0x24e   :  { %591 = vmatmul.msk.bf16.vlgmr.msrb.gmra.mxu3 %vm490_vm2, %v482_v47 }
 0x2d1   :  { %v503_v49 = vpop.f32.mrf.mxu3 }
 0x2d2   :  { %v504_v50 = vadd.f32 %v503_v49, %v489_v48 }
 0x2d4   :  { %508 = vst.msk [vmem:[#allocation3] sm:$0x1] %vm507_vm3, %v504_v50 }
 0x2d5   :  { %519 = dma.vmem_to_hbm [thread:$0]  %s515_s22, 16, %s517_s25, [#allocation4]  }
 0x2d9   :  { %v505_v51 = vpop.f32.mrf.mxu3 }
 0x2da   :  { %644 = dma.done.wait [#allocation4], 16  }
 0x2db   :  { %645 = vsyncadd [#allocation4], 4294967280 }
 0x2dc   :  { %524 = vsyncpa [#allocation4], 1 }

</bundles_post_ra>
